<compile_context>
chip_gen: v7x
topology: tpu7x:2x2x1
jax: 0.10.0
libtpu: 0.0.40
codegen_flags: <defaults>
</compile_context>

<pallas_src>
import math

import jax
import jax.numpy as jnp
import numpy as np
from jax.experimental import pallas as pl
from jax.experimental.pallas import tpu as pltpu


def _make_kernel(S, D, H, d_k, block_q, peek_cur, compute_dtype):
    maxout = not peek_cur
    inv_sqrt_dk = 1.0 / math.sqrt(d_k)
    approx_recip = compute_dtype == jnp.bfloat16
    f32 = jnp.float32

    def kernel(q_ref, k_ref, v_ref,
               wq_ref, bq_ref, wv_ref, bv_ref, wo_ref, bo_ref,
               gam_ref, lnw_ref, lnb_ref,
               out_ref, scores_ref, acc_ref):
        qi = pl.program_id(1)
        h = pl.program_id(2)
        q_start = qi * block_q

        q_in = q_ref[0]                          # (Tq, D) f32
        k_in = k_ref[0]                          # (S,  D) f32
        v_in = v_ref[0]                          # (S,  D) f32

        # ---- per-head projections (fused Q/K matmul; kq_same=True) ----
        wq = wq_ref[0].astype(compute_dtype)     # (D, d_k)
        wv = wv_ref[0].astype(compute_dtype)     # (D, d_k)
        qk_in = jnp.concatenate([q_in, k_in], axis=0).astype(compute_dtype)   # (Tq+S, D)
        qk = jnp.dot(qk_in, wq, preferred_element_type=f32) + bq_ref[0]       # f32
        qh = qk[:block_q]                        # (Tq, d_k)
        kh = qk[block_q:]                        # (S,  d_k)
        vh = jnp.dot(v_in.astype(compute_dtype), wv,
                     preferred_element_type=f32) + bv_ref[0]                  # (S, d_k)

        # ---- raw scores: contract last dims, no explicit K transpose ----
        s = jax.lax.dot_general(
            qh.astype(compute_dtype), kh.astype(compute_dtype),
            (((1,), (1,)), ((), ())),
            preferred_element_type=f32) * inv_sqrt_dk                          # (Tq, S)

        # masks / distance terms from int32 iota (single bool mask reused)
        row = q_start + jax.lax.broadcasted_iota(jnp.int32, (block_q, S), 0)
        col = jax.lax.broadcasted_iota(jnp.int32, (block_q, S), 1)
        mask = (col <= row) if peek_cur else (col < row)                       # bool
        pos_sqrt = jnp.sqrt(jnp.abs(row - col).astype(f32))                    # sqrt(|x1-x2|)

        def softmax(x):
            m = jnp.max(x, axis=-1, keepdims=True)
            e = jnp.exp(x - m)
            return e * pl.reciprocal(jnp.sum(e, axis=-1, keepdims=True),
                                     approx=approx_recip)

        # ---- distance-decay term (torch.no_grad block) ----
        p_ = softmax(jnp.where(mask, s, -1e32))                                # (Tq, S) f32
        # disttot - distcum == p_ @ M  with M[k, j] = 1 iff k > j  (one MXU matmul)
        kk = jax.lax.broadcasted_iota(jnp.int32, (S, S), 0)
        jj = jax.lax.broadcasted_iota(jnp.int32, (S, S), 1)
        tri = (kk > jj).astype(compute_dtype)
        rest = jnp.dot(p_.astype(compute_dtype), tri, preferred_element_type=f32)
        dist = jnp.sqrt(jnp.maximum(rest, 0.0)) * pos_sqrt                     # sqrt(a*b)=sqrt(a)*sqrt(b)
        g = -jnp.abs(gam_ref[0])                                               # (1, 1)
        total_effect = jnp.clip(jnp.exp(dist * g), 1e-5, 1e5)

        # ---- final softmax (+ maxout) ----
        s = jnp.where(mask, s * total_effect, -1e32)
        p = jnp.where(mask, softmax(s), 0.0)
        if maxout:
            scale = jnp.minimum(1.0 / jnp.max(p, axis=-1, keepdims=True), 5.0)
            p = p * scale
        # attdrop / dropout: identity (eval mode)
        scores_ref[0, 0] = p

        # ---- per-head contribution folded into the output projection (no concat) ----
        ctx = jnp.dot(p.astype(compute_dtype), vh.astype(compute_dtype),
                      preferred_element_type=f32)                              # (Tq, d_k)
        contrib = jnp.dot(ctx.astype(compute_dtype),
                          wo_ref[0].astype(compute_dtype),
                          preferred_element_type=f32)                          # (Tq, D)

        @pl.when(h == 0)
        def _():
            acc_ref[...] = jnp.zeros_like(acc_ref)

        acc_ref[...] += contrib

        # ---- finalize on last head: out-proj bias, residual, LayerNorm ----
        @pl.when(h == H - 1)
        def _():
            x = q_in + acc_ref[...] + bo_ref[...]
            mean = jnp.mean(x, axis=-1, keepdims=True)
            var = jnp.mean((x - mean) ** 2, axis=-1, keepdims=True)
            y = (x - mean) * jax.lax.rsqrt(var + 1e-5)
            out_ref[0] = y * lnw_ref[...] + lnb_ref[...]

    return kernel


def dtransformer_layer(query, key, values, params, n_heads, peek_cur=False,
                       *, use_bf16=True, block_q=None):
    bs, S, D = query.shape
    H = n_heads
    d_k = D // H
    if block_q is None:
        block_q = 128 if (S > 128 and S % 128 == 0) else S
    assert S % block_q == 0, "sequence length must be divisible by the query block"
    n_q = S // block_q
    compute_dtype = jnp.bfloat16 if use_bf16 else jnp.float32

    # Reshape parameters (host side, once per call) so each head is a leading-axis
    # slice -> per-head BlockSpecs, no dynamic lane slicing inside the kernel.
    wq_h = params["wq"].reshape(D, H, d_k).transpose(1, 0, 2)   # (H, D, d_k)
    wv_h = params["wv"].reshape(D, H, d_k).transpose(1, 0, 2)   # (H, D, d_k)
    wo_h = params["wo"].reshape(H, d_k, D)                      # (H, d_k, D)
    bq_h = params["bq"].reshape(H, 1, d_k)
    bv_h = params["bv"].reshape(H, 1, d_k)
    gam_h = params["gammas"].reshape(H, 1, 1)

    kernel = _make_kernel(S, D, H, d_k, block_q, peek_cur, compute_dtype)

    in_specs = [
        pl.BlockSpec((1, block_q, D), lambda b, qi, h: (b, qi, 0)),   # query (q-tiled)
        pl.BlockSpec((1, S, D),       lambda b, qi, h: (b, 0, 0)),    # key   (full)
        pl.BlockSpec((1, S, D),       lambda b, qi, h: (b, 0, 0)),    # values(full)
        pl.BlockSpec((1, D, d_k),     lambda b, qi, h: (h, 0, 0)),    # wq[h] (=wk, kq_same)
        pl.BlockSpec((1, 1, d_k),     lambda b, qi, h: (h, 0, 0)),    # bq[h]
        pl.BlockSpec((1, D, d_k),     lambda b, qi, h: (h, 0, 0)),    # wv[h]
        pl.BlockSpec((1, 1, d_k),     lambda b, qi, h: (h, 0, 0)),    # bv[h]
        pl.BlockSpec((1, d_k, D),     lambda b, qi, h: (h, 0, 0)),    # wo[h]
        pl.BlockSpec((1, D),          lambda b, qi, h: (0, 0)),       # bo
        pl.BlockSpec((1, 1, 1),       lambda b, qi, h: (h, 0, 0)),    # gamma[h]
        pl.BlockSpec((1, D),          lambda b, qi, h: (0, 0)),       # ln weight
        pl.BlockSpec((1, D),          lambda b, qi, h: (0, 0)),       # ln bias
    ]
    out_specs = [
        pl.BlockSpec((1, block_q, D),    lambda b, qi, h: (b, qi, 0)),
        pl.BlockSpec((1, 1, block_q, S), lambda b, qi, h: (b, h, qi, 0)),
    ]
    out_shape = [
        jax.ShapeDtypeStruct((bs, S, D), jnp.float32),
        jax.ShapeDtypeStruct((bs, H, S, S), jnp.float32),
    ]

    fn = pl.pallas_call(
        kernel,
        grid=(bs, n_q, H),
        in_specs=in_specs,
        out_specs=out_specs,
        out_shape=out_shape,
        scratch_shapes=[pltpu.VMEM((block_q, D), jnp.float32)],
        compiler_params=pltpu.CompilerParams(
            dimension_semantics=("parallel", "parallel", "arbitrary"),
            vmem_limit_bytes=32 * 1024 * 1024,
        ),
    )
    out, scores = fn(
        query, key, values,
        wq_h, bq_h, wv_h, bv_h, wo_h, params["bo"], gam_h,
        params["ln_w"], params["ln_b"],
    )
    return out, scores


def _reference(query, key, values, params, n_heads, peek_cur=False):
    """Pure-JAX (f32) reference reproducing the PyTorch forward (eval mode)."""
    bs, S, D = query.shape
    H = n_heads
    d_k = D // H
    wq, bq = params["wq"], params["bq"][0]
    wv, bv = params["wv"], params["bv"][0]
    wo, bo = params["wo"], params["bo"][0]
    gammas = params["gammas"][0]
    ln_w, ln_b = params["ln_w"][0], params["ln_b"][0]
    hp = "highest"

    def proj(x, w, b):
        return (jnp.dot(x, w, precision=hp) + b).reshape(bs, S, H, d_k).transpose(0, 2, 1, 3)

    q = proj(query, wq, bq)
    k = proj(key, wq, bq)
    v = proj(values, wv, bv)

    scores = jnp.einsum("bhqd,bhkd->bhqk", q, k, precision=hp) / math.sqrt(d_k)
    idx = jnp.arange(S, dtype=jnp.float32)
    mask = (idx[None, :] <= idx[:, None]) if peek_cur else (idx[None, :] < idx[:, None])
    mask = mask[None, None]
    pos_eff = jnp.abs(idx[None, :] - idx[:, None])[None, None]

    s_ = jnp.where(mask, scores, -1e32)
    s_ = jax.nn.softmax(s_, axis=-1)
    distcum = jnp.cumsum(s_, axis=-1)
    disttot = jnp.sum(s_, axis=-1, keepdims=True)
    dist = jnp.sqrt(jnp.maximum((disttot - distcum) * pos_eff, 0.0))
    g = -jnp.abs(gammas)[None, :, None, None]
    total_effect = jnp.clip(jnp.exp(dist * g), 1e-5, 1e5)
    scores = scores * total_effect
    scores = jnp.where(mask, scores, -1e32)
    scores = jax.nn.softmax(scores, axis=-1)
    scores = jnp.where(mask, scores, 0.0)
    if not peek_cur:  # maxout
        scale = jnp.minimum(1.0 / jnp.max(scores, axis=-1, keepdims=True), 5.0)
        scores = scores * scale
    out_h = jnp.einsum("bhqk,bhkd->bhqd", scores, v, precision=hp)
    concat = out_h.transpose(0, 2, 1, 3).reshape(bs, S, D)
    attn_out = jnp.dot(concat, wo, precision=hp) + bo
    x = query + attn_out
    mean = jnp.mean(x, axis=-1, keepdims=True)
    var = jnp.mean((x - mean) ** 2, axis=-1, keepdims=True)
    y = (x - mean) / jnp.sqrt(var + 1e-5)
    return y * ln_w + ln_b, scores


if __name__ == "__main__":
    bs, S, D, H = 2, 8, 32, 4
    key0 = jax.random.PRNGKey(0)
    ks = jax.random.split(key0, 12)

    def rnd(k, shape, scale=0.1):
        return jax.random.normal(k, shape, dtype=jnp.float32) * scale

    params = {
        "wq": rnd(ks[0], (D, D)),
        "bq": rnd(ks[1], (1, D)),
        "wv": rnd(ks[2], (D, D)),
        "bv": rnd(ks[3], (1, D)),
        "wo": rnd(ks[4], (D, D)),
        "bo": rnd(ks[5], (1, D)),
        "gammas": jax.random.uniform(ks[6], (1, H), jnp.float32, -1.0, 1.0),
        "ln_w": jnp.ones((1, D), jnp.float32) + rnd(ks[7], (1, D), 0.05),
        "ln_b": rnd(ks[8], (1, D), 0.05),
    }
    query = rnd(ks[9], (bs, S, D), 1.0)
    key_in = rnd(ks[10], (bs, S, D), 1.0)
    values = rnd(ks[11], (bs, S, D), 1.0)
    # `lens` is an argument of the PyTorch forward but unused by it -> omitted.

    # ---- exact-arithmetic mode (f32 matmuls): verifies algorithmic correctness ----
    for pc in (False, True):
        ref_out, ref_scores = _reference(query, key_in, values, params, H, peek_cur=pc)
        out32, sc32 = dtransformer_layer(query, key_in, values, params, H,
                                         peek_cur=pc, use_bf16=False)
        out32 = jax.block_until_ready(out32)
        sc32 = jax.block_until_ready(sc32)
        np.testing.assert_allclose(np.asarray(out32), np.asarray(ref_out),
                                   rtol=5e-4, atol=5e-4)
        np.testing.assert_allclose(np.asarray(sc32), np.asarray(ref_scores),
                                   rtol=5e-4, atol=5e-4)

    # ---- performance mode (bf16 MXU operands, f32 accumulation) ----
    # Looser tolerance reflects bf16 operand rounding only; softmax / decay / LN
    # statistics remain in f32 inside the kernel.
    ref_out, ref_scores = _reference(query, key_in, values, params, H, peek_cur=False)
    out16, sc16 = dtransformer_layer(query, key_in, values, params, H,
                                     peek_cur=False, use_bf16=True)
    out16 = jax.block_until_ready(out16)
    sc16 = jax.block_until_ready(sc16)
    np.testing.assert_allclose(np.asarray(out16), np.asarray(ref_out),
                               rtol=1e-1, atol=5e-2)
    np.testing.assert_allclose(np.asarray(sc16), np.asarray(ref_scores),
                               rtol=1e-1, atol=5e-2)

    print("KERNEL_OK")
</pallas_src>

<mosaic_0001>
module attributes {stable_mosaic.version = 11 : i64} {
  func.func @kernel(%arg0: i32, %arg1: i32, %arg2: i32, %arg3: memref<1x8x32xf32, #tpu.memory_space<vmem>>, %arg4: memref<1x8x32xf32, #tpu.memory_space<vmem>>, %arg5: memref<1x8x32xf32, #tpu.memory_space<vmem>>, %arg6: memref<1x32x8xf32, #tpu.memory_space<vmem>>, %arg7: memref<1x1x8xf32, #tpu.memory_space<vmem>>, %arg8: memref<1x32x8xf32, #tpu.memory_space<vmem>>, %arg9: memref<1x1x8xf32, #tpu.memory_space<vmem>>, %arg10: memref<1x8x32xf32, #tpu.memory_space<vmem>>, %arg11: memref<1x32xf32, #tpu.memory_space<vmem>>, %arg12: memref<1x1x1xf32, #tpu.memory_space<vmem>>, %arg13: memref<1x32xf32, #tpu.memory_space<vmem>>, %arg14: memref<1x32xf32, #tpu.memory_space<vmem>>, %arg15: memref<1x8x32xf32, #tpu.memory_space<vmem>>, %arg16: memref<1x1x8x8xf32, #tpu.memory_space<vmem>>, %arg17: memref<8x32xf32, #tpu.memory_space<vmem>>) attributes {dimension_semantics = [#tpu.dimension_semantics<parallel>, #tpu.dimension_semantics<parallel>, #tpu.dimension_semantics<arbitrary>], iteration_bounds = array<i64: 2, 1, 4>, scalar_prefetch = 0 : i64, scratch_operands = 1 : i64, tpu.core_type = #tpu.core_type<tc>, window_params = [{transform_indices = @transform_0, window_bounds = array<i64: 1, 8, 32>}, {transform_indices = @transform_1, window_bounds = array<i64: 1, 8, 32>}, {transform_indices = @transform_2, window_bounds = array<i64: 1, 8, 32>}, {transform_indices = @transform_3, window_bounds = array<i64: 1, 32, 8>}, {transform_indices = @transform_4, window_bounds = array<i64: 1, 1, 8>}, {transform_indices = @transform_5, window_bounds = array<i64: 1, 32, 8>}, {transform_indices = @transform_6, window_bounds = array<i64: 1, 1, 8>}, {transform_indices = @transform_7, window_bounds = array<i64: 1, 8, 32>}, {pipeline_mode = #tpu.pipeline_mode<synchronous>, transform_indices = @transform_8, window_bounds = array<i64: 1, 32>}, {transform_indices = @transform_9, window_bounds = array<i64: 1, 1, 1>}, {pipeline_mode = #tpu.pipeline_mode<synchronous>, transform_indices = @transform_10, window_bounds = array<i64: 1, 32>}, {pipeline_mode = #tpu.pipeline_mode<synchronous>, transform_indices = @transform_11, window_bounds = array<i64: 1, 32>}, {transform_indices = @transform_12, window_bounds = array<i64: 1, 8, 32>}, {transform_indices = @transform_13, window_bounds = array<i64: 1, 1, 8, 8>}]} {
    %c8_i32 = arith.constant 8 : i32
    %0 = arith.muli %arg1, %c8_i32 : i32
    %c0 = arith.constant 0 : index
    %c0_0 = arith.constant 0 : index
    %c0_1 = arith.constant 0 : index
    %1 = vector.load %arg3[%c0, %c0_0, %c0_1] : memref<1x8x32xf32, #tpu.memory_space<vmem>>, vector<1x8x32xf32>
    %2 = vector.shape_cast %1 : vector<1x8x32xf32> to vector<8x32xf32>
    %c0_2 = arith.constant 0 : index
    %c0_3 = arith.constant 0 : index
    %c0_4 = arith.constant 0 : index
    %3 = vector.load %arg4[%c0_2, %c0_3, %c0_4] : memref<1x8x32xf32, #tpu.memory_space<vmem>>, vector<1x8x32xf32>
    %4 = vector.shape_cast %3 : vector<1x8x32xf32> to vector<8x32xf32>
    %c0_5 = arith.constant 0 : index
    %c0_6 = arith.constant 0 : index
    %c0_7 = arith.constant 0 : index
    %5 = vector.load %arg5[%c0_5, %c0_6, %c0_7] : memref<1x8x32xf32, #tpu.memory_space<vmem>>, vector<1x8x32xf32>
    %6 = vector.shape_cast %5 : vector<1x8x32xf32> to vector<8x32xf32>
    %c0_8 = arith.constant 0 : index
    %c0_9 = arith.constant 0 : index
    %c0_10 = arith.constant 0 : index
    %7 = vector.load %arg6[%c0_8, %c0_9, %c0_10] : memref<1x32x8xf32, #tpu.memory_space<vmem>>, vector<1x32x8xf32>
    %8 = vector.shape_cast %7 : vector<1x32x8xf32> to vector<32x8xf32>
    %c0_11 = arith.constant 0 : index
    %c0_12 = arith.constant 0 : index
    %c0_13 = arith.constant 0 : index
    %9 = vector.load %arg8[%c0_11, %c0_12, %c0_13] : memref<1x32x8xf32, #tpu.memory_space<vmem>>, vector<1x32x8xf32>
    %10 = vector.shape_cast %9 : vector<1x32x8xf32> to vector<32x8xf32>
    %11 = tpu.concatenate %2, %4 in 0 : vector<8x32xf32>, vector<8x32xf32> -> vector<16x32xf32>
    %cst = arith.constant dense<0.000000e+00> : vector<16x8xf32>
    %12 = tpu.matmul %11, %8, %cst {dimension_numbers = #tpu.dot_dimension_numbers<[1], [0], [0], [1], [0, 0, 1, 1], [], []>} : vector<16x32xf32>, vector<32x8xf32>, vector<16x8xf32> -> vector<16x8xf32>
    %c0_14 = arith.constant 0 : index
    %c0_15 = arith.constant 0 : index
    %c0_16 = arith.constant 0 : index
    %13 = vector.load %arg7[%c0_14, %c0_15, %c0_16] : memref<1x1x8xf32, #tpu.memory_space<vmem>>, vector<1x1x8xf32>
    %14 = vector.shape_cast %13 : vector<1x1x8xf32> to vector<1x8xf32>
    %15 = vector.broadcast %14 : vector<1x8xf32> to vector<16x8xf32>
    %16 = arith.addf %12, %15 : vector<16x8xf32>
    %17 = vector.extract_strided_slice %16 {offsets = [0, 0], sizes = [8, 8], strides = [1, 1]} : vector<16x8xf32> to vector<8x8xf32>
    %18 = vector.extract_strided_slice %16 {offsets = [8, 0], sizes = [8, 8], strides = [1, 1]} : vector<16x8xf32> to vector<8x8xf32>
    %cst_17 = arith.constant dense<0.000000e+00> : vector<8x8xf32>
    %19 = tpu.matmul %6, %10, %cst_17 {dimension_numbers = #tpu.dot_dimension_numbers<[1], [0], [0], [1], [0, 0, 1, 1], [], []>} : vector<8x32xf32>, vector<32x8xf32>, vector<8x8xf32> -> vector<8x8xf32>
    %c0_18 = arith.constant 0 : index
    %c0_19 = arith.constant 0 : index
    %c0_20 = arith.constant 0 : index
    %20 = vector.load %arg9[%c0_18, %c0_19, %c0_20] : memref<1x1x8xf32, #tpu.memory_space<vmem>>, vector<1x1x8xf32>
    %21 = vector.shape_cast %20 : vector<1x1x8xf32> to vector<1x8xf32>
    %22 = vector.broadcast %21 : vector<1x8xf32> to vector<8x8xf32>
    %23 = arith.addf %19, %22 : vector<8x8xf32>
    %cst_21 = arith.constant dense<0.000000e+00> : vector<8x8xf32>
    %24 = tpu.matmul %17, %18, %cst_21 {dimension_numbers = #tpu.dot_dimension_numbers<[1], [1], [0], [0], [0, 0, 1, 0], [], []>} : vector<8x8xf32>, vector<8x8xf32>, vector<8x8xf32> -> vector<8x8xf32>
    %cst_22 = arith.constant 0.353553385 : f32
    %25 = vector.broadcast %cst_22 : f32 to vector<8x8xf32>
    %26 = arith.mulf %24, %25 : vector<8x8xf32>
    %27 = tpu.iota {dimensions = array<i32: 0>} : vector<8x8xi32>
    %28 = vector.broadcast %0 : i32 to vector<8x8xi32>
    %29 = arith.addi %28, %27 : vector<8x8xi32>
    %30 = tpu.iota {dimensions = array<i32: 1>} : vector<8x8xi32>
    %31 = arith.cmpi slt, %30, %29 : vector<8x8xi32>
    %32 = arith.subi %29, %30 : vector<8x8xi32>
    %33 = math.absi %32 : vector<8x8xi32>
    %34 = arith.sitofp %33 : vector<8x8xi32> to vector<8x8xf32>
    %35 = math.sqrt %34 : vector<8x8xf32>
    %cst_23 = arith.constant -1.000000e+32 : f32
    %36 = vector.broadcast %cst_23 : f32 to vector<8x8xf32>
    %37 = arith.select %31, %26, %36 : vector<8x8xi1>, vector<8x8xf32>
    %cst_24 = arith.constant dense<0xFF800000> : vector<8xf32>
    %38 = vector.multi_reduction <maximumf>, %37, %cst_24 [1] : vector<8x8xf32> to vector<8xf32>
    %39 = vector.shape_cast %38 : vector<8xf32> to vector<8x1xf32>
    %40 = vector.broadcast %39 : vector<8x1xf32> to vector<8x8xf32>
    %41 = arith.subf %37, %40 : vector<8x8xf32>
    %42 = math.exp %41 : vector<8x8xf32>
    %cst_25 = arith.constant dense<0.000000e+00> : vector<8xf32>
    %43 = vector.multi_reduction <add>, %42, %cst_25 [1] : vector<8x8xf32> to vector<8xf32>
    %44 = vector.shape_cast %43 : vector<8xf32> to vector<8x1xf32>
    %45 = tpu.reciprocal %44 : vector<8x1xf32> -> vector<8x1xf32>
    %46 = vector.broadcast %45 : vector<8x1xf32> to vector<8x8xf32>
    %47 = arith.mulf %42, %46 : vector<8x8xf32>
    %48 = tpu.iota {dimensions = array<i32: 0>} : vector<8x8xi32>
    %49 = tpu.iota {dimensions = array<i32: 1>} : vector<8x8xi32>
    %50 = arith.cmpi sgt, %48, %49 : vector<8x8xi32>
    %51 = arith.extui %50 : vector<8x8xi1> to vector<8x8xi32>
    %52 = arith.sitofp %51 : vector<8x8xi32> to vector<8x8xf32>
    %cst_26 = arith.constant dense<0.000000e+00> : vector<8x8xf32>
    %53 = tpu.matmul %47, %52, %cst_26 {dimension_numbers = #tpu.dot_dimension_numbers<[1], [0], [0], [1], [0, 0, 1, 1], [], []>} : vector<8x8xf32>, vector<8x8xf32>, vector<8x8xf32> -> vector<8x8xf32>
    %cst_27 = arith.constant 0.000000e+00 : f32
    %54 = vector.broadcast %cst_27 : f32 to vector<8x8xf32>
    %55 = arith.maximumf %53, %54 : vector<8x8xf32>
    %56 = math.sqrt %55 : vector<8x8xf32>
    %57 = arith.mulf %56, %35 : vector<8x8xf32>
    %c0_28 = arith.constant 0 : index
    %c0_29 = arith.constant 0 : index
    %c0_30 = arith.constant 0 : index
    %58 = vector.load %arg12[%c0_28, %c0_29, %c0_30] : memref<1x1x1xf32, #tpu.memory_space<vmem>>, vector<1x1x1xf32>
    %59 = vector.shape_cast %58 : vector<1x1x1xf32> to vector<1x1xf32>
    %60 = math.absf %59 : vector<1x1xf32>
    %cst_31 = arith.constant 0.000000e+00 : f32
    %61 = vector.broadcast %cst_31 : f32 to vector<1x1xf32>
    %62 = arith.subf %61, %60 : vector<1x1xf32>
    %63 = vector.broadcast %62 : vector<1x1xf32> to vector<8x8xf32>
    %64 = arith.mulf %57, %63 : vector<8x8xf32>
    %65 = math.exp %64 : vector<8x8xf32>
    %cst_32 = arith.constant 9.99999974E-6 : f32
    %cst_33 = arith.constant 1.000000e+05 : f32
    %66 = vector.broadcast %cst_32 : f32 to vector<8x8xf32>
    %67 = arith.maximumf %66, %65 : vector<8x8xf32>
    %68 = vector.broadcast %cst_33 : f32 to vector<8x8xf32>
    %69 = arith.minimumf %68, %67 : vector<8x8xf32>
    %70 = arith.mulf %26, %69 : vector<8x8xf32>
    %cst_34 = arith.constant -1.000000e+32 : f32
    %71 = vector.broadcast %cst_34 : f32 to vector<8x8xf32>
    %72 = arith.select %31, %70, %71 : vector<8x8xi1>, vector<8x8xf32>
    %cst_35 = arith.constant dense<0xFF800000> : vector<8xf32>
    %73 = vector.multi_reduction <maximumf>, %72, %cst_35 [1] : vector<8x8xf32> to vector<8xf32>
    %74 = vector.shape_cast %73 : vector<8xf32> to vector<8x1xf32>
    %75 = vector.broadcast %74 : vector<8x1xf32> to vector<8x8xf32>
    %76 = arith.subf %72, %75 : vector<8x8xf32>
    %77 = math.exp %76 : vector<8x8xf32>
    %cst_36 = arith.constant dense<0.000000e+00> : vector<8xf32>
    %78 = vector.multi_reduction <add>, %77, %cst_36 [1] : vector<8x8xf32> to vector<8xf32>
    %79 = vector.shape_cast %78 : vector<8xf32> to vector<8x1xf32>
    %80 = tpu.reciprocal %79 : vector<8x1xf32> -> vector<8x1xf32>
    %81 = vector.broadcast %80 : vector<8x1xf32> to vector<8x8xf32>
    %82 = arith.mulf %77, %81 : vector<8x8xf32>
    %cst_37 = arith.constant 0.000000e+00 : f32
    %83 = vector.broadcast %cst_37 : f32 to vector<8x8xf32>
    %84 = arith.select %31, %82, %83 : vector<8x8xi1>, vector<8x8xf32>
    %cst_38 = arith.constant dense<0xFF800000> : vector<8xf32>
    %85 = vector.multi_reduction <maximumf>, %84, %cst_38 [1] : vector<8x8xf32> to vector<8xf32>
    %86 = vector.shape_cast %85 : vector<8xf32> to vector<8x1xf32>
    %cst_39 = arith.constant 1.000000e+00 : f32
    %87 = vector.broadcast %cst_39 : f32 to vector<8x1xf32>
    %88 = arith.divf %87, %86 : vector<8x1xf32>
    %cst_40 = arith.constant 5.000000e+00 : f32
    %89 = vector.broadcast %cst_40 : f32 to vector<8x1xf32>
    %90 = arith.minimumf %88, %89 : vector<8x1xf32>
    %91 = vector.broadcast %90 : vector<8x1xf32> to vector<8x8xf32>
    %92 = arith.mulf %84, %91 : vector<8x8xf32>
    %c0_41 = arith.constant 0 : index
    %c0_42 = arith.constant 0 : index
    %c0_43 = arith.constant 0 : index
    %c0_44 = arith.constant 0 : index
    %93 = vector.load %arg16[%c0_41, %c0_42, %c0_43, %c0_44] : memref<1x1x8x8xf32, #tpu.memory_space<vmem>>, vector<1x1x8x8xf32>
    %94 = vector.shape_cast %93 : vector<1x1x8x8xf32> to vector<8x8xf32>
    %95 = vector.shape_cast %92 : vector<8x8xf32> to vector<1x1x8x8xf32>
    tpu.vector_store %arg16[%c0_41, %c0_42, %c0_43, %c0_44], %95 {strides = array<i32>} : memref<1x1x8x8xf32, #tpu.memory_space<vmem>>, vector<1x1x8x8xf32>,
    %cst_45 = arith.constant dense<0.000000e+00> : vector<8x8xf32>
    %96 = tpu.matmul %92, %23, %cst_45 {dimension_numbers = #tpu.dot_dimension_numbers<[1], [0], [0], [1], [0, 0, 1, 1], [], []>} : vector<8x8xf32>, vector<8x8xf32>, vector<8x8xf32> -> vector<8x8xf32>
    %c0_46 = arith.constant 0 : index
    %c0_47 = arith.constant 0 : index
    %c0_48 = arith.constant 0 : index
    %97 = vector.load %arg10[%c0_46, %c0_47, %c0_48] : memref<1x8x32xf32, #tpu.memory_space<vmem>>, vector<1x8x32xf32>
    %98 = vector.shape_cast %97 : vector<1x8x32xf32> to vector<8x32xf32>
    %cst_49 = arith.constant dense<0.000000e+00> : vector<8x32xf32>
    %99 = tpu.matmul %96, %98, %cst_49 {dimension_numbers = #tpu.dot_dimension_numbers<[1], [0], [0], [1], [0, 0, 1, 1], [], []>} : vector<8x8xf32>, vector<8x32xf32>, vector<8x32xf32> -> vector<8x32xf32>
    %c0_i32 = arith.constant 0 : i32
    %100 = arith.cmpi eq, %arg2, %c0_i32 : i32
    %101 = arith.extui %100 : i1 to i32
    %c0_i32_50 = arith.constant 0 : i32
    %102 = arith.cmpi ne, %101, %c0_i32_50 : i32
    scf.if %102 {
      %cst_56 = arith.constant 0.000000e+00 : f32
      %109 = vector.broadcast %cst_56 : f32 to vector<8x32xf32>
      %c0_57 = arith.constant 0 : index
      %c0_58 = arith.constant 0 : index
      %110 = vector.load %arg17[%c0_57, %c0_58] : memref<8x32xf32, #tpu.memory_space<vmem>>, vector<8x32xf32>
      tpu.vector_store %arg17[%c0_57, %c0_58], %109 {strides = array<i32>} : memref<8x32xf32, #tpu.memory_space<vmem>>, vector<8x32xf32>,
    } else {
    }
    %c0_51 = arith.constant 0 : index
    %c0_52 = arith.constant 0 : index
    %103 = vector.load %arg17[%c0_51, %c0_52] : memref<8x32xf32, #tpu.memory_space<vmem>>, vector<8x32xf32>
    %104 = arith.addf %103, %99 : vector<8x32xf32>
    %c0_53 = arith.constant 0 : index
    %c0_54 = arith.constant 0 : index
    %105 = vector.load %arg17[%c0_53, %c0_54] : memref<8x32xf32, #tpu.memory_space<vmem>>, vector<8x32xf32>
    tpu.vector_store %arg17[%c0_53, %c0_54], %104 {strides = array<i32>} : memref<8x32xf32, #tpu.memory_space<vmem>>, vector<8x32xf32>,
    %c3_i32 = arith.constant 3 : i32
    %106 = arith.cmpi eq, %arg2, %c3_i32 : i32
    %107 = arith.extui %106 : i1 to i32
    %c0_i32_55 = arith.constant 0 : i32
    %108 = arith.cmpi ne, %107, %c0_i32_55 : i32
    scf.if %108 {
      %c0_56 = arith.constant 0 : index
      %c0_57 = arith.constant 0 : index
      %109 = vector.load %arg17[%c0_56, %c0_57] : memref<8x32xf32, #tpu.memory_space<vmem>>, vector<8x32xf32>
      %110 = arith.addf %2, %109 : vector<8x32xf32>
      %c0_58 = arith.constant 0 : index
      %c0_59 = arith.constant 0 : index
      %111 = vector.load %arg11[%c0_58, %c0_59] : memref<1x32xf32, #tpu.memory_space<vmem>>, vector<1x32xf32>
      %112 = vector.broadcast %111 : vector<1x32xf32> to vector<8x32xf32>
      %113 = arith.addf %110, %112 : vector<8x32xf32>
      %cst_60 = arith.constant dense<0.000000e+00> : vector<8xf32>
      %114 = vector.multi_reduction <add>, %113, %cst_60 [1] : vector<8x32xf32> to vector<8xf32>
      %115 = vector.shape_cast %114 : vector<8xf32> to vector<8x1xf32>
      %cst_61 = arith.constant 3.200000e+01 : f32
      %116 = vector.broadcast %cst_61 : f32 to vector<8x1xf32>
      %117 = arith.divf %115, %116 : vector<8x1xf32>
      %118 = vector.broadcast %117 : vector<8x1xf32> to vector<8x32xf32>
      %119 = arith.subf %113, %118 : vector<8x32xf32>
      %120 = arith.mulf %119, %119 : vector<8x32xf32>
      %cst_62 = arith.constant dense<0.000000e+00> : vector<8xf32>
      %121 = vector.multi_reduction <add>, %120, %cst_62 [1] : vector<8x32xf32> to vector<8xf32>
      %122 = vector.shape_cast %121 : vector<8xf32> to vector<8x1xf32>
      %cst_63 = arith.constant 3.200000e+01 : f32
      %123 = vector.broadcast %cst_63 : f32 to vector<8x1xf32>
      %124 = arith.divf %122, %123 : vector<8x1xf32>
      %125 = vector.broadcast %117 : vector<8x1xf32> to vector<8x32xf32>
      %126 = arith.subf %113, %125 : vector<8x32xf32>
      %cst_64 = arith.constant 9.99999974E-6 : f32
      %127 = vector.broadcast %cst_64 : f32 to vector<8x1xf32>
      %128 = arith.addf %124, %127 : vector<8x1xf32>
      %129 = math.rsqrt %128 : vector<8x1xf32>
      %130 = vector.broadcast %129 : vector<8x1xf32> to vector<8x32xf32>
      %131 = arith.mulf %126, %130 : vector<8x32xf32>
      %c0_65 = arith.constant 0 : index
      %c0_66 = arith.constant 0 : index
      %132 = vector.load %arg13[%c0_65, %c0_66] : memref<1x32xf32, #tpu.memory_space<vmem>>, vector<1x32xf32>
      %133 = vector.broadcast %132 : vector<1x32xf32> to vector<8x32xf32>
      %134 = arith.mulf %131, %133 : vector<8x32xf32>
      %c0_67 = arith.constant 0 : index
      %c0_68 = arith.constant 0 : index
      %135 = vector.load %arg14[%c0_67, %c0_68] : memref<1x32xf32, #tpu.memory_space<vmem>>, vector<1x32xf32>
      %136 = vector.broadcast %135 : vector<1x32xf32> to vector<8x32xf32>
      %137 = arith.addf %134, %136 : vector<8x32xf32>
      %c0_69 = arith.constant 0 : index
      %c0_70 = arith.constant 0 : index
      %c0_71 = arith.constant 0 : index
      %138 = vector.load %arg15[%c0_69, %c0_70, %c0_71] : memref<1x8x32xf32, #tpu.memory_space<vmem>>, vector<1x8x32xf32>
      %139 = vector.shape_cast %138 : vector<1x8x32xf32> to vector<8x32xf32>
      %140 = vector.shape_cast %137 : vector<8x32xf32> to vector<1x8x32xf32>
      tpu.vector_store %arg15[%c0_69, %c0_70, %c0_71], %140 {strides = array<i32>} : memref<1x8x32xf32, #tpu.memory_space<vmem>>, vector<1x8x32xf32>,
    } else {
    }
    return
  }
  func.func @transform_0(%arg0: i32, %arg1: i32, %arg2: i32) -> (i32, i32, i32) {
    %c0_i32 = arith.constant 0 : i32
    %c0_i32_0 = arith.constant 0 : i32
    return %arg0, %arg1, %c0_i32 : i32, i32, i32
  }
  func.func @transform_1(%arg0: i32, %arg1: i32, %arg2: i32) -> (i32, i32, i32) {
    %c0_i32 = arith.constant 0 : i32
    %c0_i32_0 = arith.constant 0 : i32
    %c0_i32_1 = arith.constant 0 : i32
    return %arg0, %c0_i32, %c0_i32_0 : i32, i32, i32
  }
  func.func @transform_2(%arg0: i32, %arg1: i32, %arg2: i32) -> (i32, i32, i32) {
    %c0_i32 = arith.constant 0 : i32
    %c0_i32_0 = arith.constant 0 : i32
    %c0_i32_1 = arith.constant 0 : i32
    return %arg0, %c0_i32, %c0_i32_0 : i32, i32, i32
  }
  func.func @transform_3(%arg0: i32, %arg1: i32, %arg2: i32) -> (i32, i32, i32) {
    %c0_i32 = arith.constant 0 : i32
    %c0_i32_0 = arith.constant 0 : i32
    %c0_i32_1 = arith.constant 0 : i32
    return %arg2, %c0_i32, %c0_i32_0 : i32, i32, i32
  }
  func.func @transform_4(%arg0: i32, %arg1: i32, %arg2: i32) -> (i32, i32, i32) {
    %c0_i32 = arith.constant 0 : i32
    %c0_i32_0 = arith.constant 0 : i32
    %c0_i32_1 = arith.constant 0 : i32
    return %arg2, %c0_i32, %c0_i32_0 : i32, i32, i32
  }
  func.func @transform_5(%arg0: i32, %arg1: i32, %arg2: i32) -> (i32, i32, i32) {
    %c0_i32 = arith.constant 0 : i32
    %c0_i32_0 = arith.constant 0 : i32
    %c0_i32_1 = arith.constant 0 : i32
    return %arg2, %c0_i32, %c0_i32_0 : i32, i32, i32
  }
  func.func @transform_6(%arg0: i32, %arg1: i32, %arg2: i32) -> (i32, i32, i32) {
    %c0_i32 = arith.constant 0 : i32
    %c0_i32_0 = arith.constant 0 : i32
    %c0_i32_1 = arith.constant 0 : i32
    return %arg2, %c0_i32, %c0_i32_0 : i32, i32, i32
  }
  func.func @transform_7(%arg0: i32, %arg1: i32, %arg2: i32) -> (i32, i32, i32) {
    %c0_i32 = arith.constant 0 : i32
    %c0_i32_0 = arith.constant 0 : i32
    %c0_i32_1 = arith.constant 0 : i32
    return %arg2, %c0_i32, %c0_i32_0 : i32, i32, i32
  }
  func.func @transform_8(%arg0: i32, %arg1: i32, %arg2: i32) -> (i32, i32) {
    %c0_i32 = arith.constant 0 : i32
    %c0_i32_0 = arith.constant 0 : i32
    %c0_i32_1 = arith.constant 0 : i32
    return %c0_i32, %c0_i32_0 : i32, i32
  }
  func.func @transform_9(%arg0: i32, %arg1: i32, %arg2: i32) -> (i32, i32, i32) {
    %c0_i32 = arith.constant 0 : i32
    %c0_i32_0 = arith.constant 0 : i32
    %c0_i32_1 = arith.constant 0 : i32
    return %arg2, %c0_i32, %c0_i32_0 : i32, i32, i32
  }
  func.func @transform_10(%arg0: i32, %arg1: i32, %arg2: i32) -> (i32, i32) {
    %c0_i32 = arith.constant 0 : i32
    %c0_i32_0 = arith.constant 0 : i32
    %c0_i32_1 = arith.constant 0 : i32
    return %c0_i32, %c0_i32_0 : i32, i32
  }
  func.func @transform_11(%arg0: i32, %arg1: i32, %arg2: i32) -> (i32, i32) {
    %c0_i32 = arith.constant 0 : i32
    %c0_i32_0 = arith.constant 0 : i32
    %c0_i32_1 = arith.constant 0 : i32
    return %c0_i32, %c0_i32_0 : i32, i32
  }
  func.func @transform_12(%arg0: i32, %arg1: i32, %arg2: i32) -> (i32, i32, i32) {
    %c0_i32 = arith.constant 0 : i32
    %c0_i32_0 = arith.constant 0 : i32
    return %arg0, %arg1, %c0_i32 : i32, i32, i32
  }
  func.func @transform_13(%arg0: i32, %arg1: i32, %arg2: i32) -> (i32, i32, i32, i32) {
    %c0_i32 = arith.constant 0 : i32
    %c0_i32_0 = arith.constant 0 : i32
    return %arg0, %arg2, %arg1, %c0_i32 : i32, i32, i32, i32
  }
}

</mosaic_0001>

<bundles_post_ra>
// kernel: tpu_custom_call.1
= control target key start
LH: loop header
LB: loop body
LE: loop exit
PB: predicated region body
PF: predicated region fallthrough
CT: control target
= control target key end

     0   :  { %s2285_s0 = inlined_call_operand.vmem [shape: f32[2,8,32], index: 0, kind: input, shape index: {}]   ;;  %s2286_s1 = inlined_call_operand.vmem [shape: f32[2,8,32], index: 1, kind: input, shape index: {}]   ;;  %s2287_s2 = inlined_call_operand.vmem [shape: f32[2,8,32], index: 2, kind: input, shape index: {}]   ;;  %s2288_s3 = inlined_call_operand.vmem [shape: f32[4,32,8], index: 3, kind: input, shape index: {}]   ;;  %s2289_s4 = inlined_call_operand.vmem [shape: f32[4,1,8], index: 4, kind: input, shape index: {}]   ;;  %s2290_s5 = inlined_call_operand.vmem [shape: f32[4,32,8], index: 5, kind: input, shape index: {}]   ;;  %s2291_s6 = inlined_call_operand.vmem [shape: f32[4,1,8], index: 6, kind: input, shape index: {}]   ;;  %s2292_s7 = inlined_call_operand.vmem [shape: f32[4,8,32], index: 7, kind: input, shape index: {}]   ;;  %s2293_s8 = inlined_call_operand.vmem [shape: f32[1,32], index: 8, kind: input, shape index: {}]   ;;  %s2294_s9 = inlined_call_operand.vmem [shape: f32[4,1,1], index: 9, kind: input, shape index: {}]   ;;  %s2295_s10 = inlined_call_operand.vmem [shape: f32[1,32], index: 10, kind: input, shape index: {}]   ;;  %s2296_s11 = inlined_call_operand.vmem [shape: f32[1,32], index: 11, kind: input, shape index: {}]   ;;  %s2297_s12 = inlined_call_operand.hbm [shape: f32[2,8,32], index: 12, kind: output, shape index: {0}]   ;;  %s2298_s13 = inlined_call_operand.hbm [shape: f32[2,4,8,8], index: 13, kind: output, shape index: {1}]  }
   0x1   :  { %2312 = sst [smem:[#allocation17_spill]] %s2285_s0 }
   0x2   :  { %2313 = sst [smem:[#allocation18_spill]] %s2286_s1 }
   0x3   :  { %2314 = sst [smem:[#allocation19_spill]] %s2287_s2 }
   0x4   :  { %2315 = sst [smem:[#allocation20_spill]] %s2288_s3 }
   0x5   :  { %2316 = sst [smem:[#allocation21_spill]] %s2289_s4 }
   0x6   :  { %2317 = sst [smem:[#allocation22_spill]] %s2290_s5 }
   0x7   :  { %2318 = sst [smem:[#allocation23_spill]] %s2293_s8 }
   0x8   :  { %2319 = sst [smem:[#allocation24_spill]] %s2295_s10 }
   0x9   :  { %2320 = sst [smem:[#allocation25_spill]] %s2296_s11 }
   0xa   :  { %2321 = sst [smem:[#allocation26_spill]] %s2297_s12 }
   0xb   :  { %2322 = sst [smem:[#allocation27_spill]] %s2298_s13 }
   0xc   :  { %19 = vsyncpa [#allocation4], 0 }
   0xd   :  { %21 = vsyncpa [#allocation4 + $0x1], 0 }
   0xe   :  { %22 = vsyncpa [#allocation6], 0 }
   0xf   :  { %24 = vsyncpa [#allocation6 + $0x1], 0  ;;  %s1938_s25 = smov 0   ;;  %s1940_s26 = smov 0  }
  0x10   :  { %s1942_s27 = smov 0   ;;  %s1944_s28 = smov 0  }
  0x11   :  { %s1946_s29 = smov 0   ;;  %s1948_s30 = smov 0  }
  0x12   :  { %s1950_s14 = smov 0   ;;  %s1952_s15 = smov 0  }
  0x13   :  { %s1954_s16 = smov 0   ;;  %s1956_s17 = smov 0  }
  0x14   :  { %s1958_s18 = smov 0  }
  0x15 LB: > { %2323 = sst [smem:[#allocation9_spill]] %s1830_s28  ;;  %s1465_s19 = sadd.s32 4294967295, %s1858_s18   ;;  %s1858_s18 = sphi %s1958_s18, %s30_s18   ;;  %s1854_s17 = sphi %s1956_s17, %s2360_s17   ;;  %s1850_s16 = sphi %s1954_s16, %s2366_s16   ;;  %s1846_s15 = sphi %s1952_s15, %s2358_s15   ;;  %s1842_s14 = sphi %s1950_s14, %s2357_s14   ;;  %s1838_s30 = sphi %s1948_s30, %s2356_s30   ;;  %s1834_s29 = sphi %s1946_s29, %s2365_s29   ;;  %s1830_s28 = sphi %s1944_s28, %s2364_s28   ;;  %s1826_s27 = sphi %s1942_s27, %s2363_s27   ;;  %s1822_s26 = sphi %s1940_s26, %s2362_s26   ;;  %s1818_s25 = sphi %s1938_s25, %s2361_s25  }
  0x16   : > { %2324 = sst [smem:[#allocation10_spill]] %s1838_s30  ;;  %s1466_s20 = sadd.s32 4294967294, %s1858_s18  }
  0x17   : > { %2325 = sst [smem:[#allocation11_spill]] %s1850_s16  ;;  %s42_s21 = sadd.s32 1, %s1850_s16 }
  0x18   : > { %2326 = sst [smem:[#allocation12_spill]] %s1854_s17  ;;  %s49_s22 = sadd.s32 1, %s1854_s17 }
  0x19   : > { %p43_p0 = scmp.ge.s32.totalorder %s42_s21, 4  ;;  %s357_s23 = sadd.s32 1, %s1838_s30 }
  0x1a   : > { %p367_p1 = scmp.ne.s32.totalorder %s1838_s30, %s1834_s29  ;;  %p2000_p2 = scmp.eq.s32.totalorder %s1465_s19, 7 }
  0x1b   : > { %s2368_s21 = smov (%p43_p0, %s42_s21), 0  ;;  %s2370_s22 = smov (!%p43_p0, %s49_s22), %s1854_s17 }
  0x1c   : > { %2328 = sst [smem:[#allocation13_spill]] %s2368_s21  ;;  %p2009_p3 = por %p2000_p2, %p367_p1 }
  0x1d   : > { %p373_p4 = scmp.ne.s32.totalorder %s1834_s29, %s1830_s28  ;;  %p51_p5 = scmp.ge.s32.totalorder %s2370_s22, 2 }
  0x1e   : > { %s2329_s13 = scalar_select %p2009_p3, 1, 0 }
  0x1f   : > { %p2015_p6 = scmp.eq.s32.totalorder %s1466_s20, 7  ;;  %s381_s12 = ssub.s32 %s1850_s16, %s2368_s21 }
  0x20   : > { %2330 = sst [smem:[#allocation14_spill]] %s2329_s13  ;;  %s387_s11 = sadd.s32 1, %s1826_s27 }
  0x21   : > { %s2372_s22 = smov (%p51_p5, %s2370_s22), 0  ;;  %p2026_p7 = por %p2015_p6, %p373_p4 }
  0x22   : > { %2332 = sst [smem:[#allocation15_spill]] %s2372_s22  ;;  %p397_p8 = scmp.ne.s32.totalorder %s1826_s27, %s1822_s26 }
  0x23   : > { %s352_s28 = ssub.s32 %s1854_s17, %s2372_s22  ;;  %p403_p9 = scmp.ne.s32.totalorder %s1822_s26, %s1818_s25 }
  0x24   : > { %p355_p10 = scmp.eq.s32.totalorder %s352_s28, 0  ;;  %s382_s20 = sor.u32 %s381_s12, %s352_s28 }
  0x25   : > { %p385_p11 = scmp.eq.s32.totalorder %s382_s20, 0  ;;  %p2038_p12 = por %p397_p8, %p2000_p2 }
  0x26   : > { %s2043_s21 = scalar_select %p355_p10, %s1838_s30, %s357_s23  }
  0x27   : > { %s2046_s16 = scalar_select %p385_p11, %s1826_s27, %s387_s11  }
  0x28   : > { %2335 = sst [smem:[#allocation16_spill]] %s2043_s21  ;;  %p2050_p13 = por %p403_p9, %p2015_p6 }
  0x29   : > { %p1469_p0 = scmp.ge.s32.totalorder %s1858_s18, 1  ;;  %p496_p1 = scmp.lt.s32.totalorder %s1858_s18, 9 }
  0x2a   : > { %s2336_s8 = scalar_select %p2050_p13, 1, 0 }
  0x2b   : > { %p497_p4 = pnand %p1469_p0, %p496_p1 }
  0x2c   : > { %s2308_s12 = sand.u32 (!%p497_p4), 1, %s1834_s29   ;;  %p593_p2 = scmp.lt.s32.totalorder (!%p497_p4), %s1842_s14, 3  ;;  %vm635_vm0 = vcmask (!%p497_p4), 261120   ;;  %v1860_v8 = vmov (!%p497_p4), 0.0   ;;  %vm1861_vm1 = vmmov (!%p497_p4), 0   ;;  %vm797_vm2 = vcmask (!%p497_p4), 64512  }
  0x2d   : > { %500 = sbr.rel (%p497_p4) target bundleno = 2348 (0x92c), region = 68  ;;  %s2060_s11 = sshll.u32 (!%p497_p4), %s2308_s12, 3  ;;  %1545 = vmatprep.mubr.msk.f32.mxu1 (!%p497_p4), %vm1861_vm1, %v1860_v8  ;;  %v875_v14 = vlaneseq (!%p497_p4)  ;;  %v1862_v30 = vmov (!%p497_p4), 0.0|0.0   ;;  %v1863_v35 = vmov (!%p497_p4), 1.0   ;;  %v1864_v36 = vmov (!%p497_p4), 0  }
  0x2e   : > { %p578_p5 = scmp.lt.s32.totalorder (!%p497_p4), %s1846_s15, 1  ;;  %s2337_s3 = sld [smem:[#allocation20_spill]] (!%p497_p4)  ;;  %1576 = vmatprep.subr.bf16.mxu1 (!%p497_p4), %v1862_v30  ;;  %1688 = vset.pattern.permute.xlu1 (!%p497_p4), %v1864_v36 }
  0x2f   : > { %s2338_s0 = sld [smem:[#allocation17_spill]] (!%p497_p4)  ;;  %s2339_s1 = sld [smem:[#allocation18_spill]] (!%p497_p4)  ;;  %v2102_v15 = vshrl.u32 (!%p497_p4), %v875_v14, 7  ;;  %v2104_v16 = vand.u32 (!%p497_p4), 127, %v875_v14  ;;  %1689 = vset.pattern.permute.xlu0 (!%p497_p4), %v1864_v36 }
  0x30   : > { %s2340_s4 = sld [smem:[#allocation21_spill]] (!%p497_p4)  ;;  %s2341_s5 = sld [smem:[#allocation22_spill]] (!%p497_p4) }
  0x31   : > { %vm881_vm3 = vcmp.lt.s32.totalorder (!%p497_p4), %v2104_v16, %v2102_v15  ;;  %s2342_s2 = sld [smem:[#allocation19_spill]] (!%p497_p4)  ;;  %vm906_vm4 = vcmp.gt.s32.totalorder (!%p497_p4), %v2102_v15, %v2104_v16  ;;  %v997_v39 = vsub.s32 (!%p497_p4), 0, %v2102_v15  ;;  %v882_v49 = vsub.s32 (!%p497_p4), %v2102_v15, %v2104_v16  ;;  %p1493_p6 = scmp.ne.s32.totalorder (!%p497_p4), %s1842_s14, 0 }
  0x33   : > { %v884_v50 = vsub.s32 (!%p497_p4), 0, %v882_v49 }
  0x34   : > { %s2064_s28 = scalar_select %p593_p2, %s1842_s14, 3 }
  0x35   : > { %s579_s23 = scalar_select %p578_p5, %s1846_s15, 1  ;;  %v1487_v51 = vmin.u32 %v884_v50, %v882_v49 }
  0x36   : > { %s1505_s24 = sshll.u32 %s2064_s28, 5  ;;  %s615_s12 = scalar_lea.vmem %s2294_s9, %s2064_s28 }
  0x37   : > { %s597_s22 = scalar_lea.vmem %s2337_s3, %s1505_s24  ;;  %s2073_s17 = sshll.u32 %s579_s23, 3  ;;  %v991_v37 = vld [vmem:[%s615_s12] sm:$0x1]  ;;  %v886_v52 = vcvt.s32.f32 %v1487_v51 }
  0x38   : > { %v620_v0 = vld [vmem:[%s597_s22] sm:$0xff]  ;;  %v621_v1 = vld [vmem:[%s597_s22 + $0x8] sm:$0xff]  ;;  %v622_v2 = vld [vmem:[%s597_s22 + $0x10] sm:$0xff]  ;;  %s584_s30 = scalar_lea.vmem %s2338_s0, %s2073_s17  ;;  %s588_s20 = scalar_lea.vmem %s2339_s1, %s2073_s17  ;;  %v992_v38 = vand.u32 2147483647, %v991_v37 }
  0x39   : > { %v1568_v3 = vpack.c.bf16 %v621_v1, %v620_v0  ;;  %v623_v4 = vld [vmem:[%s597_s22 + $0x18] sm:$0xff]  ;;  %v2079_v5 = vld [vmem:[%s584_s30] sm:$0xff]  ;;  %s600_s22 = scalar_lea.vmem %s2340_s4, %s2064_s28  ;;  %s605_s19 = scalar_lea.vmem %s2341_s5, %s1505_s24  ;;  %vm889_vm5 = vcmp.eq.f32.partialorder %v886_v52, inf  ;;  %v892_v58 = vand.u32 2147483648, %v886_v52  ;;  %vm891_vm6 = vcmp.eq.f32.partialorder %v886_v52, 0.0 }
  0x3a   : > { %v1572_v6 = vpack.c.bf16 %v623_v4, %v622_v2  ;;  %1534 = vmatprep.mubr.msk.f32.mxu0 %vm635_vm0, %v2079_v5  ;;  %v618_v7 = vld [vmem:[%s588_s20] sm:$0xff]  ;;  %v625_v28 = vld [vmem:[%s605_s19 + $0x8] sm:$0xff]  ;;  %v626_v31 = vld [vmem:[%s605_s19 + $0x10] sm:$0xff]  ;;  %s592_s21 = scalar_lea.vmem %s2342_s2, %s2073_s17  ;;  %v993_v40 = vsub.f32 0.0, %v992_v38  ;;  %s1479_s20 = sshll.u32 %s2064_s28, 3 }
  0x3b   : > { %1569 = vmatprep.subr.bf16.mxu0 %v1568_v3  ;;  %v1480_v9 = vld [vmem:[%s600_s22] ss:$0 sm:$0xff]  ;;  %v627_v32 = vld [vmem:[%s605_s19 + $0x18] sm:$0xff]  ;;  %s612_s24 = scalar_lea.vmem %s2292_s7, %s1479_s20  ;;  %s2310_s22 = sand.u32 1, %s1822_s26  }
  0x3c   : > { %1571 = vmatpush3.bf16.msra.mxu0 %v1568_v3  ;;  %v624_v27 = vld [vmem:[%s605_s19] sm:$0xff]  ;;  %v1580_v33 = vpack.c.bf16 %v627_v32, %v626_v31  ;;  %v998_v41 = vrot.slane %v993_v40, %v997_v39  ;;  %s608_s19 = scalar_lea.vmem %s2291_s6, %s2064_s28  ;;  %s2163_s12 = sshll.u32 %s2310_s22, 3  ;;  %v1865_v32 = vmov (!%p1493_p6), 0.0  }
  0x3d   : > { %1573 = vmatprep.subr.bf16.mxu0 %v1572_v6  ;;  %v1577_v29 = vpack.c.bf16 %v625_v28, %v624_v27  ;;  %v619_v34 = vld [vmem:[%s592_s21] sm:$0xff]  ;;  %s2311_s17 = scalar_lea.vmem [#allocation5], %s2163_s12  ;;  %s570_s28 = scalar_lea.vmem [#allocation3], %s2060_s11  ;;  %1181 = vst.msk [vmem:[#allocation2] sm:$0xff] (!%p1493_p6), %vm635_vm0, %v1865_v32 }
  0x3e   : > { %1000 = vperm.xlu1 %1688, %v998_v41   ;;  %v1483_v45 = vld [vmem:[%s608_s19] ss:$0 sm:$0xff] }
  0x3f   : > { %1578 = vmatpush3.bf16.msra.mxu1 %v1577_v29 }
  0x40   : > { %1575 = vmatpush3.bf16.msra.mxu0 %v1572_v6  ;;  %1579 = vmatprep.subr.bf16.mxu1 %v1862_v30 }
  0x41   : > { %1548 = vmatprep.subr.mxu0 %v1860_v8 }
  0x43   : > { %1535 = vmatmul.mubr.msk.f32.vlgmr.msra.gmra.mrb[0].mxu0 %vm635_vm0, %v618_v7  ;;  %1581 = vmatpush3.bf16.msra.mxu1 %v1580_v33 }
  0x44   : > { %1550 = vmatprep.mubr.msk.f32.mxu0 %vm1861_vm1, %v1860_v8  ;;  %1553 = vmatprep.subr.mxu1 %v1860_v8 }
  0x46   : > { %1546 = vmatmul.mubr.msk.f32.vlgmr.msra.gmra.mrb[0].mxu1 %vm635_vm0, %v619_v34 }
  0x47   : > { %1555 = vmatprep.mubr.msk.f32.mxu1 %vm1861_vm1, %v1860_v8  ;;  %1554 = vmatpush3.msk.msra.mxu1 %vm906_vm4, %v1863_v35 }
  0x48   : > { %1563 = vmatprep.subr.mxu1 %v1860_v8 }
  0xbd   : > { %v1001_v1 = vpop.permute.xlu1 %1000 }
 0x116   : > { %v1536_v10 = vpop.f32.mrb[0].mxu0 }
 0x117   : > { %v714_v11 = vadd.f32 %v1536_v10, %v1480_v9  ;;  %v708_v12 = vpop.f32.mrb[1].mxu0 }
 0x118   : > { %v709_v13 = vadd.f32 %v1480_v9, %v708_v12 }
 0x119   : > { %1549 = vmatpush3.xpose.msk.msra.mxu0 %vm797_vm2, %v714_v11  ;;  %v793_v46 = vpop.f32.mrb[0].mxu1 }
 0x11a   : > { %1558 = vmatprep.subr.mxu0 %v1860_v8  ;;  %v794_v47 = vadd.f32 %v1483_v45, %v793_v46  ;;  %v1547_v48 = vpop.f32.mrb[1].mxu1 }
 0x11c   : > { %1551 = vmatmul.mubr.msk.f32.vlgmr.msra.gmra.mrb[2].mxu0 %vm797_vm2, %v709_v13 }
 0x11d   : > { %1560 = vmatprep.mubr.msk.f32.mxu0 %vm1861_vm1, %v1860_v8  ;;  %1559 = vmatpush3.msra.mxu0 %v794_v47 }
 0x1ef   : > { %v870_v17 = vpop.f32.mrb[2].mxu0 }
 0x1f0   : > { %v2108_v18 = vmul.f32 0.35355338, %v870_v17  ;;  %v1552_v19 = vpop.f32.mrb[3].mxu0 }
 0x1f2   : > { %v894_v20 = vsel %vm881_vm3, %v2108_v18, -1e+32 }
 0x1f3   : > { %v895_v21 = vsel %vm797_vm2, %v894_v20, -inf }
 0x1f4   : > { %896 = vmax.xlane.f32.xlu0 %v895_v21 }
 0x281   : > { %v897_v22 = vpop.xlane.xlu0 %896 }
 0x282   : > { %v898_v23 = vsub.f32 %v894_v20, %v897_v22 }
 0x284   : > { %v899_v24 = vmul.f32 1.442695, %v898_v23 }
 0x286   : > { %1690 = vpow2.f32 %v899_v24 }
 0x290   : > { %v1691_v25 = vpop.eup %1690 }
 0x291   : > { %v901_v26 = vsel %vm797_vm2, %v1691_v25, 0.0 }
 0x292   : > { %902 = vadd.xlane.f32.xlu0 %v901_v26 }
 0x31f   : > { %v903_v42 = vpop.xlane.xlu0 %902 }
 0x320   : > { %1692 = vrcp.f32 %v903_v42 }
 0x321   : > { %1694 = vrsqrt.f32 %v886_v52 }
 0x32a   : > { %v1693_v43 = vpop.eup %1692 }
 0x32b   : > { %v905_v44 = vmul.f32 %v1693_v43, %v1691_v25  ;;  %v1695_v56 = vpop.eup %1694  ;;  %v1103_v25 = vld [vmem:[%s612_s24] sm:$0xff] }
 0x32c   : > { %v888_v57 = vmul.f32 %v1695_v56, %v886_v52 }
 0x32d   : > { %1556 = vmatmul.mubr.msk.f32.vlgmr.msra.gmra.mrb[2].mxu1 %vm797_vm2, %v905_v44 }
 0x32e   : > { %1565 = vmatprep.mubr.msk.f32.mxu1 %vm1861_vm1, %v1860_v8  ;;  %v890_v59 = vsel %vm889_vm5, %v886_v52, %v888_v57  ;;  %1564 = vmatpush3.msra.mxu1 %v1103_v25 }
 0x32f   : > { %v893_v62 = vsel %vm891_vm6, %v892_v58, %v890_v59 }
 0x400   : > { %v978_v53 = vpop.f32.mrb[2].mxu1 }
 0x401   : > { %v982_v54 = vmax.f32 %v978_v53, 0.0  ;;  %v1557_v55 = vpop.f32.mrb[3].mxu1 }
 0x403   : > { %1696 = vrsqrt.f32 %v982_v54  ;;  %vm985_vm7 = vcmp.eq.f32.partialorder %v982_v54, inf  ;;  %v988_v63 = vand.u32 2147483648, %v982_v54  ;;  %vm987_vm8 = vcmp.eq.f32.partialorder %v982_v54, 0.0 }
 0x40d   : > { %v1697_v60 = vpop.eup %1696 }
 0x40e   : > { %v984_v61 = vmul.f32 %v1697_v60, %v982_v54 }
 0x410   : > { %v986_v0 = vsel %vm985_vm7, %v982_v54, %v984_v61 }
 0x411   : > { %v989_v2 = vsel %vm987_vm8, %v988_v63, %v986_v0 }
 0x412   : > { %v990_v3 = vmul.f32 %v989_v2, %v893_v62 }
 0x414   : > { %v1003_v4 = vmul.f32 %v1001_v1, %v990_v3 }
 0x416   : > { %v1004_v6 = vmul.f32 1.442695, %v1003_v4 }
 0x418   : > { %1698 = vpow2.f32 %v1004_v6 }
 0x422   : > { %v1699_v7 = vpop.eup %1698 }
 0x423   : > { %v1006_v8 = vmax.f32 %v1699_v7, 1e-05 }
 0x425   : > { %v1007_v9 = vmin.f32 %v1006_v8, 100000.0 }
 0x427   : > { %v1008_v10 = vmul.f32 %v1007_v9, %v2108_v18 }
 0x429   : > { %v1009_v11 = vsel %vm881_vm3, %v1008_v10, -1e+32 }
 0x42a   : > { %v1010_v12 = vsel %vm797_vm2, %v1009_v11, -inf }
 0x42b   : > { %1011 = vmax.xlane.f32.xlu1 %v1010_v12 }
 0x4b8   : > { %v1012_v13 = vpop.xlane.xlu1 %1011 }
 0x4b9   : > { %v1013_v14 = vsub.f32 %v1009_v11, %v1012_v13 }
 0x4bb   : > { %v1014_v17 = vmul.f32 1.442695, %v1013_v14 }
 0x4bd   : > { %1700 = vpow2.f32 %v1014_v17 }
 0x4c7   : > { %v1701_v19 = vpop.eup %1700 }
 0x4c8   : > { %v1016_v20 = vsel %vm797_vm2, %v1701_v19, 0.0 }
 0x4c9   : > { %1017 = vadd.xlane.f32.xlu0 %v1016_v20 }
 0x556   : > { %v1018_v21 = vpop.xlane.xlu0 %1017 }
 0x557   : > { %1702 = vrcp.f32 %v1018_v21 }
 0x561   : > { %v1703_v18 = vpop.eup %1702 }
 0x562   : > { %v1020_v22 = vmul.f32 %v1703_v18, %v1701_v19 }
 0x564   : > { %v1021_v23 = vsel %vm881_vm3, %v1020_v22, 0.0 }
 0x565   : > { %v1022_v24 = vsel %vm797_vm2, %v1021_v23, -inf }
 0x566   : > { %1023 = vmax.xlane.f32.xlu0 %v1022_v24 }
 0x5f3   : > { %v1024_v26 = vpop.xlane.xlu0 %1023 }
 0x5f4   : > { %1704 = vrcp.f32 %v1024_v26 }
 0x5fe   : > { %v1705_v15 = vpop.eup %1704 }
 0x5ff   : > { %v1027_v16 = vmin.f32 %v1705_v15, 5.0 }
 0x601   : > { %v1028_v27 = vmul.f32 %v1027_v16, %v1021_v23 }
 0x603   : > { %1029 = vst.msk [vmem:[%s2311_s17] sm:$0xff] %vm797_vm2, %v1028_v27  ;;  %1561 = vmatmul.mubr.msk.f32.vlgmr.msra.gmra.mrb[4].mxu0 %vm797_vm2, %v1028_v27 }
 0x6d6   : > { %v1099_v28 = vpop.f32.mrb[4].mxu0 }
 0x6d7   : > { %v1562_v29 = vpop.f32.mrb[5].mxu0  ;;  %1566 = vmatmul.mubr.msk.f32.vlgmr.msra.gmra.mrb[4].mxu1 %vm797_vm2, %v1099_v28 }
 0x7a5   : > { %1180 = sbr.rel (%p1493_p6) target bundleno = 1964 (0x7ac), region = 72 }
 0x7aa   : > { %v1173_v30 = vpop.f32.mrb[4].mxu1 }
 0x7ab   : > { %v1567_v31 = vpop.f32.mrb[5].mxu1 }
 0x7ac PF: > { %v1182_v33 = vld [vmem:[#allocation2] sm:$0xff]  ;;  %p1494_p8 = scmp.ne.s32.totalorder %s1842_s14, 3 }
 0x7ad   : > { %v1183_v34 = vadd.f32 %v1182_v33, %v1173_v30  ;;  %s2343_s20 = sld [smem:[#allocation23_spill]] (!%p1494_p8)  ;;  %s2344_s24 = sld [smem:[#allocation24_spill]] (!%p1494_p8) }
 0x7ae   : > { %1188 = sbr.rel (%p1494_p8) target bundleno = 2293 (0x8f5), region = 76 }
 0x7af   : > { %1184 = vst.msk [vmem:[#allocation2] sm:$0xff] %vm635_vm0, %v1183_v34 }
 0x7b3   : > { %v1495_v36 = vld [vmem:[%s2343_s20] ss:$0 sm:$0xff] (!%p1494_p8)  ;;  %s2345_s20 = sld [smem:[#allocation25_spill]] (!%p1494_p8) }
 0x7b6   : > { %v1189_v35 = vld [vmem:[#allocation2] sm:$0xff] }
 0x7b7   : > { %v1190_v37 = vadd.f32 %v1189_v35, %v2079_v5  ;;  %v1496_v5 = vld [vmem:[%s2344_s24] ss:$0 sm:$0xff] }
 0x7b9   : > { %v1198_v38 = vadd.f32 %v1495_v36, %v1190_v37  ;;  %v1497_v50 = vld [vmem:[%s2345_s20] ss:$0 sm:$0xff] }
 0x7bb   : > { %v1199_v39 = vsel %vm635_vm0, %v1198_v38, 0.0 }
 0x7bc   : > { %1200 = vadd.xlane.f32.xlu0 %v1199_v39 }
 0x849   : > { %v1201_v40 = vpop.xlane.xlu0 %1200 }
 0x84a   : > { %v1203_v41 = vmul.f32 0.03125, %v1201_v40 }
 0x84c   : > { %v1204_v42 = vsub.f32 %v1198_v38, %v1203_v41 }
 0x84e   : > { %v1205_v43 = vmul.f32 %v1204_v42, %v1204_v42 }
 0x850   : > { %v1206_v44 = vsel %vm635_vm0, %v1205_v43, 0.0 }
 0x851   : > { %1207 = vadd.xlane.f32.xlu0 %v1206_v44 }
 0x8de   : > { %v1208_v45 = vpop.xlane.xlu0 %1207 }
 0x8df   : > { %v1209_v46 = vmul.f32 0.03125, %v1208_v45 }
 0x8e1   : > { %v1210_v47 = vadd.f32 1e-05, %v1209_v46 }
 0x8e3   : > { %1706 = vrsqrt.f32 %v1210_v47 }
 0x8ed   : > { %v1707_v48 = vpop.eup %1706 }
 0x8ee   : > { %v1212_v49 = vmul.f32 %v1707_v48, %v1204_v42 }
 0x8f0   : > { %v1220_v51 = vmul.f32 %v1496_v5, %v1212_v49 }
 0x8f2   : > { %v1228_v52 = vadd.f32 %v1497_v50, %v1220_v51 }
 0x8f4   : > { %1229 = vst.msk [vmem:[%s570_s28] sm:$0xff] %vm635_vm0, %v1228_v52 }
 0x8f5 PF: > { %s1500_s17 = sshll.u32 %s1846_s15, 7  ;;  %s2347_s30 = sld [smem:[#allocation26_spill]] }
 0x8f6   : > { %s1250_s2 = sshll.u32 %s570_s28, 4  ;;  %s2349_s23 = sand.u32 1, %s1834_s29   ;;  %s1251_s2 = int_to_ptr.vmem [resolvable:$true] %s1250_s2 }
 0x8f7   : > { %s1231_s19 = scalar_lea.sflag [#allocation4], %s2349_s23  ;;  %s1708_s20 = scalar_lea.vmem %s1251_s2, 128 }
 0x8f8   : > { %p1709_p9 = scmp.ne.s32.totalorder %s1251_s2, %s1708_s20  ;;  %s1866_s3 = smov [#allocation3]  }
 0x8f9   : > { %s1712_s4 = sshll.u32 %s1866_s3, 4  ;;  %s1713_s4 = int_to_ptr.vmem [resolvable:$false] %s1712_s4 }
 0x8fa   : > { %p1710_p10 = pnand %p1709_p9, %p2009_p3  ;;  %s1714_s5 = scalar_lea.vmem %s1713_s4, 256 }
 0x8fb   : > { %s2348_s21 = smov %s2347_s30  ;;  %s2195_s24 = scalar_lea.hbm %s2347_s30, %s1500_s17 }
 0x8fc   : > { %p1711_p11 = pneg %p1710_p10  ;;  %p1715_p0 = scmp.lt.s32.totalorder %s1251_s2, %s1713_s4 }
 0x8fd   : > { %p1716_p1 = scmp.lt.s32.totalorder %s1714_s5, %s1708_s20 }
 0x8ff   : > { %p1717_p4 = por %p1716_p1, %p1715_p0 }
 0x901   : > { %p1718_p2 = pnand %p1717_p4, %p1711_p11 }
 0x903   : > { %1721 = shalt.err (!%p1718_p2)
}
 0x904   : > { %s1722_s0 = scalar_lea.hbm %s2195_s24, 128  ;;  %s1726_s3 = scalar_lea.hbm %s2348_s21, 256 }
 0x905   : > { %p1723_p5 = scmp.ne.s32.totalorder %s2195_s24, %s1722_s0  ;;  %p1727_p9 = scmp.lt.u32.totalorder %s2195_s24, %s2348_s21 }
 0x906   : > { %p1728_p10 = scmp.lt.u32.totalorder %s1726_s3, %s1722_s0  ;;  %p1730_p0 = scmp.lt.u32.totalorder %s1722_s0, %s2195_s24 }
 0x907   : > { %p1724_p6 = pnand %p1723_p5, %p2009_p3 }
 0x908   : > { %p1729_p11 = por %p1728_p10, %p1727_p9 }
 0x909   : > { %p1725_p8 = pneg %p1724_p6 }
 0x90a   : > { %p1731_p1 = por %p1730_p0, %p1729_p11 }
 0x90c   : > { %p1732_p4 = pnand %p1731_p1, %p1725_p8 }
 0x90e   : > { %1735 = shalt.err (!%p1732_p4)
}
 0x90f   : > { %1582 = dma.vmem_to_hbm [thread:$0]  (%p2009_p3), %s1251_s2, 128, %s2195_s24, %s1231_s19  }
 0x910   : > { %s1501_s5 = sshll.u32 %s1846_s15, 2  ;;  %s2350_s28 = scalar_lea.vmem [#allocation5], %s2163_s12 }
 0x911   : > { %s1266_s30 = sshll.u32 %s2350_s28, 4  ;;  %s1262_s23 = sadd.s32 %s1842_s14, %s1501_s5  ;;  %s2222_s30 = int_to_ptr.vmem [resolvable:$true] %s1266_s30 }
 0x912   : > { %s1502_s20 = sshll.u32 %s1262_s23, 7  ;;  %s2351_s22 = sld [smem:[#allocation27_spill]] }
 0x913   : > { %s2352_s3 = sand.u32 1, %s1822_s26   ;;  %s1736_s4 = scalar_lea.vmem %s2222_s30, 128 }
 0x914   : > { %s1236_s17 = scalar_lea.sflag [#allocation6], %s2352_s3  ;;  %p1737_p2 = scmp.ne.s32.totalorder %s2222_s30, %s1736_s4 }
 0x915   : > { %s1867_s2 = smov [#allocation5]  }
 0x916   : > { %p1738_p3 = pnand %p1737_p2, %p2038_p12  ;;  %s1740_s15 = sshll.u32 %s1867_s2, 4  ;;  %s1741_s15 = int_to_ptr.vmem [resolvable:$false] %s1740_s15 }
 0x917   : > { %s1742_s14 = scalar_lea.vmem %s1741_s15, 256  ;;  %p1743_p6 = scmp.lt.s32.totalorder %s2222_s30, %s1741_s15 }
 0x918   : > { %s1264_s11 = scalar_lea.hbm %s2351_s22, %s1502_s20  ;;  %p1739_p5 = pneg %p1738_p3 }
 0x919   : > { %p1744_p8 = scmp.lt.s32.totalorder %s1742_s14, %s1736_s4 }
 0x91b   : > { %p1745_p9 = por %p1744_p8, %p1743_p6 }
 0x91d   : > { %p1746_p10 = pnand %p1745_p9, %p1739_p5 }
 0x91f   : > { %1749 = shalt.err (!%p1746_p10)
}
 0x920   : > { %s1750_s12 = scalar_lea.hbm %s1264_s11, 128  ;;  %s1754_s5 = scalar_lea.hbm %s2351_s22, 1024 }
 0x921   : > { %p1751_p11 = scmp.ne.s32.totalorder %s1264_s11, %s1750_s12  ;;  %p1755_p4 = scmp.lt.u32.totalorder %s1264_s11, %s2351_s22 }
 0x922   : > { %p1756_p2 = scmp.lt.u32.totalorder %s1754_s5, %s1750_s12  ;;  %p1758_p13 = scmp.lt.u32.totalorder %s1750_s12, %s1264_s11 }
 0x923   : > { %p1752_p0 = pnand %p1751_p11, %p2038_p12 }
 0x924   : > { %p1757_p3 = por %p1756_p2, %p1755_p4 }
 0x925   : > { %p1753_p1 = pneg %p1752_p0 }
 0x926   : > { %p1759_p6 = por %p1758_p13, %p1757_p3 }
 0x928   : > { %p1760_p5 = pnand %p1759_p6, %p1753_p1 }
 0x92a   : > { %1763 = shalt.err (!%p1760_p5)
}
 0x92b   : > { %1583 = dma.vmem_to_hbm [thread:$0]  (%p2038_p12), %s2222_s30, 128, %s1264_s11, %s1236_s17  }
 0x92c PF: > { %s2353_s20 = sld [smem:[#allocation9_spill]]  ;;  %p1593_p8 = scmp.ge.s32.totalorder %s1858_s18, 2 }
 0x92e   : > { %p1587_p9 = pnand %p1593_p8, %p2026_p7 }
 0x932   : > { %s1278_s0 = sand.u32 1, %s2353_s20  }
 0x933   : > { %s1279_s1 = scalar_lea.sflag [#allocation4], %s1278_s0 }
 0x934   : > { %1809 = dma.done.wait (!%p1587_p9), %s1279_s1, 128  }
 0x935   : > { %1811 = vsyncadd (!%p1587_p9), %s1279_s1, 4294967168  ;;  %s1287_s3 = sand.u32 1, %s1818_s25   ;;  %p2354_p13 = scmp.ne.s32.totalorder %s2336_s8, 0 }
 0x936   : > { %s1288_s4 = scalar_lea.sflag [#allocation6], %s1287_s3 }
 0x937   : > { %p1590_p10 = pnand %p1593_p8, %p2354_p13 }
 0x939   : > { %1813 = dma.done.wait (!%p1590_p10), %s1288_s4, 128  }
 0x93a   : > { %1815 = vsyncadd (!%p1590_p10), %s1288_s4, 4294967168  ;;  %s30_s18 = sadd.s32 1, %s1858_s18   ;;  %s2355_s10 = sld [smem:[#allocation10_spill]] }
 0x93b   : > { %p27_p12 = scmp.ge.s32.totalorder %s30_s18, 10   ;;  %s2356_s30 = sld [smem:[#allocation16_spill]] }
 0x93c   : > { %s2357_s14 = sld [smem:[#allocation11_spill]]  ;;  %s2358_s15 = sld [smem:[#allocation12_spill]] }
 0x93d   : > { %s2359_s13 = sld [smem:[#allocation13_spill]]  ;;  %s2360_s17 = sld [smem:[#allocation15_spill]] }
 0x93e   : > { %s2361_s25 = smov %s1822_s26  ;;  %s2362_s26 = smov %s1826_s27 }
 0x93f   : > { %s2363_s27 = smov %s2046_s16  ;;  %s2364_s28 = smov %s1834_s29 }
 0x940   : > { %s2365_s29 = smov %s2355_s10  ;;  %29 = sbr.rel (!%p27_p12) target bundleno = 21 (0x15), region = 152 }
 0x943   : > { %s2366_s16 = smov %s2359_s13 }
 0x947   :  { %1293 = vsyncpa [#allocation4], 1 }
 0x948   :  { %1295 = vsyncpa [#allocation4 + $0x1], 1 }
 0x949   :  { %1296 = vsyncpa [#allocation6], 1 }
 0x94a   :  { %1298 = vsyncpa [#allocation6 + $0x1], 1 }

</bundles_post_ra>
